<compile_context>
chip_gen: v5e
topology: v5e:2x2
jax: 0.10.0
libtpu: 0.0.40
codegen_flags: <defaults>
</compile_context>

<pallas_src>
import functools

import jax
import jax.numpy as jnp
from jax.experimental import pallas as pl
from jax.experimental.pallas import tpu as pltpu


def _round_up(x, m):
    return (x + m - 1) // m * m


def _pick_tile(n, prefs=(256, 128)):
    # Largest preferred tile that divides N; otherwise the full extent so that
    # small/test sizes keep full-dim (legal) blocks.
    for p in prefs:
        if n % p == 0:
            return p
    return n


# -----------------------------------------------------------------------------
# Pass 1: LayerNorm + fused packed projection + SiLU + q/k l2-normalization.
# Grid: (batch, sequence-tile), both parallel.
# -----------------------------------------------------------------------------
def _proj_kernel(x_ref, gamma_ref, beta_ref, wp_ref, bp_ref,
                 v_ref, gate_ref, q_ref, k_ref, *, n_heads, head_dim, dv):
    f32 = jnp.float32
    bf16 = jnp.bfloat16
    D = head_dim
    E = n_heads * dv
    HD = n_heads * D

    x = x_ref[0].astype(f32)                                   # (tn, C)

    # LayerNorm (eps=1e-5, biased variance) in f32 on the VPU.
    mu = jnp.mean(x, axis=-1, keepdims=True)
    var = jnp.mean((x - mu) ** 2, axis=-1, keepdims=True)
    xn = (x - mu) * jax.lax.rsqrt(var + 1e-5)
    xn = xn * gamma_ref[...] + beta_ref[...]

    # One fused MXU matmul for [v | gate | q_all | k_all]; bf16 in, f32 acc.
    # Weights were pre-transposed host-side to (C, P): no in-kernel transpose.
    proj = jnp.dot(xn.astype(bf16), wp_ref[...],
                   preferred_element_type=f32) + bp_ref[...]   # (tn, P) f32
    proj = proj * jax.nn.sigmoid(proj)                         # SiLU (f32)

    v = proj[:, :E]
    gate = proj[:, E:2 * E]
    q_all = proj[:, 2 * E:2 * E + HD]
    k_all = proj[:, 2 * E + HD:]

    def l2norm_heads(t):
        # F.normalize(p=2, eps=1e-12) per head; head-major contiguous layout.
        parts = []
        for h in range(n_heads):
            th = t[:, h * D:(h + 1) * D]
            inv = jax.lax.rsqrt(
                jnp.maximum(jnp.sum(th * th, -1, keepdims=True), 1e-24))
            parts.append(th * inv)
        return jnp.concatenate(parts, axis=-1)

    v_ref[0] = v.astype(v_ref.dtype)
    gate_ref[0] = gate.astype(gate_ref.dtype)
    q_ref[0] = l2norm_heads(q_all).astype(q_ref.dtype)
    k_ref[0] = l2norm_heads(k_all).astype(k_ref.dtype)


# -----------------------------------------------------------------------------
# Pass 2: flash-style cosine attention + gating + fused output projection.
# Grid: (batch, q-tile, kv-tile); kv axis is the reduction ("arbitrary").
# -----------------------------------------------------------------------------
def _attn_kernel(maskq_ref, maskk_ref, pos_ref, q_ref, k_ref, v_ref, gate_ref,
                 wout_ref, bout_ref, temp_ref, o_ref, m_sc, l_sc, acc_sc,
                 *, n_heads, head_dim, dv):
    f32 = jnp.float32
    bf16 = jnp.bfloat16
    D = head_dim
    kv = pl.program_id(2)

    @pl.when(kv == 0)
    def _():
        m_sc[...] = jnp.full_like(m_sc, -jnp.inf)
        l_sc[...] = jnp.zeros_like(l_sc)
        acc_sc[...] = jnp.zeros_like(acc_sc)

    temp = temp_ref[0, 0]                                      # scalar from SMEM

    # Padding mask folded into one additive bias per (q,kv) tile: masked
    # entries get a large finite negative (matches masked_fill semantics
    # without a per-head select and without inf/NaN hazards).
    keep_i = jnp.transpose(maskq_ref[0] == 0.0)                # (tq, 1)
    keep_j = (maskk_ref[0] == 0.0)                             # (1, tk)
    bias = jnp.where(jnp.logical_and(keep_i, keep_j),
                     pos_ref[...], jnp.float32(-1e30))         # (tq, tk) f32

    q = q_ref[0]                                               # (tq, H*D) bf16
    k = k_ref[0]                                               # (tk, H*D) bf16
    v = v_ref[0]                                               # (tk, E)   bf16

    for h in range(n_heads):                                   # static unroll
        qh = q[:, h * D:(h + 1) * D]
        kh = k[:, h * D:(h + 1) * D]
        # Contract the last dims directly (no materialized transpose).
        s = jax.lax.dot_general(qh, kh, (((1,), (1,)), ((), ())),
                                preferred_element_type=f32)
        s = s * temp + bias                                    # (tq, tk) f32

        m_old = m_sc[h]                                        # (tq, 1)
        m_new = jnp.maximum(m_old, jnp.max(s, axis=-1, keepdims=True))
        alpha = jnp.exp(m_old - m_new)
        p = jnp.exp(s - m_new)                                 # (tq, tk) f32
        l_sc[h] = alpha * l_sc[h] + jnp.sum(p, axis=-1, keepdims=True)
        # Head-major accumulator: full-tile store, no masked partial-lane write.
        acc_sc[h] = (alpha * acc_sc[h]
                     + jnp.dot(p.astype(bf16), v[:, h * dv:(h + 1) * dv],
                               preferred_element_type=f32))
        m_sc[h] = m_new

    @pl.when(kv == pl.num_programs(2) - 1)
    def _():
        parts = []
        for h in range(n_heads):
            inv = pl.reciprocal(l_sc[h], approx=True)          # EUP slot
            parts.append(acc_sc[h] * inv)                      # (tq, dv)
        gated = jnp.concatenate(parts, axis=-1) * gate_ref[0]  # (tq, E)
        # Single fused output projection: one big-K MXU matmul, lane-dense store.
        o = jnp.dot(gated.astype(bf16), wout_ref[...],
                    preferred_element_type=f32) + bout_ref[...]
        o_ref[0] = o.astype(o_ref.dtype)


# -----------------------------------------------------------------------------
# Wrapper: host-side weight packing + the two pallas_calls.
# -----------------------------------------------------------------------------
def cosine_gau_forward(x, mask, pos, params, *, n_heads, head_dim,
                       expansion_factor):
    """x: (B,N,C) f32, mask: (B,1,N) f32 (0=keep, nonzero=masked), pos: (N,N)."""
    B, N, C = x.shape
    E = C * expansion_factor
    assert E % n_heads == 0
    dv = E // n_heads
    D = head_dim
    HD = n_heads * D
    P = 2 * E + 2 * HD
    C_pad = _round_up(C, 128)            # lane-dense output stores

    f32 = jnp.float32
    bf16 = jnp.bfloat16

    # ---- host-side weight packing (trace-time, free) ----
    # PyTorch Linear weights are (out, in): transpose to (in, out) so the kernel
    # computes x @ W; reorder q/k rows head-major (all q heads, then all k
    # heads); fuse both projections into one (C, 2E + 2HD) matrix; cast to bf16.
    w_vg = params["w_vg"]                               # (2E, C): [v ; gate]
    w_qk = params["w_qk"].reshape(n_heads, 2, D, C)     # (H, {q,k}, D, C)
    w_q = w_qk[:, 0].reshape(HD, C)
    w_k = w_qk[:, 1].reshape(HD, C)
    w_packed = jnp.concatenate([w_vg[:E], w_vg[E:], w_q, w_k], axis=0)
    w_packed = jnp.transpose(w_packed).astype(bf16)     # (C, P)

    b_vg = params["b_vg"].reshape(-1)
    b_qk = params["b_qk"].reshape(n_heads, 2, D)
    b_packed = jnp.concatenate(
        [b_vg[:E], b_vg[E:], b_qk[:, 0].reshape(HD), b_qk[:, 1].reshape(HD)]
    ).reshape(1, P).astype(f32)

    w_out = jnp.transpose(params["w_out"]).astype(bf16)  # (E, C)
    b_out = params["b_out"].astype(f32)                  # (1, C)
    if C_pad != C:
        w_out = jnp.pad(w_out, ((0, 0), (0, C_pad - C)))
        b_out = jnp.pad(b_out, ((0, 0), (0, C_pad - C)))

    # ---- pass 1: LayerNorm + fused projections ----
    tn = _pick_tile(N)
    proj_kernel = functools.partial(_proj_kernel, n_heads=n_heads,
                                    head_dim=D, dv=dv)
    fixed2 = lambda shape: pl.BlockSpec(shape, lambda b, t: (0,) * len(shape))
    v_a, gate_a, q_a, k_a = pl.pallas_call(
        proj_kernel,
        out_shape=(
            jax.ShapeDtypeStruct((B, N, E), bf16),    # v  (MXU operand later)
            jax.ShapeDtypeStruct((B, N, E), bf16),    # gate (multiplied in f32)
            jax.ShapeDtypeStruct((B, N, HD), bf16),   # q (l2-normalized)
            jax.ShapeDtypeStruct((B, N, HD), bf16),   # k (l2-normalized)
        ),
        grid_spec=pltpu.PrefetchScalarGridSpec(
            num_scalar_prefetch=0,
            grid=(B, N // tn),
            in_specs=[
                pl.BlockSpec((1, tn, C), lambda b, t: (b, t, 0)),   # x
                fixed2((1, C)),                                     # ln gamma
                fixed2((1, C)),                                     # ln beta
                fixed2((C, P)),                                     # packed W
                fixed2((1, P)),                                     # packed b
            ],
            out_specs=(
                pl.BlockSpec((1, tn, E), lambda b, t: (b, t, 0)),
                pl.BlockSpec((1, tn, E), lambda b, t: (b, t, 0)),
                pl.BlockSpec((1, tn, HD), lambda b, t: (b, t, 0)),
                pl.BlockSpec((1, tn, HD), lambda b, t: (b, t, 0)),
            ),
        ),
        compiler_params=pltpu.CompilerParams(
            dimension_semantics=("parallel", "parallel")),
    )(x, params["gamma"], params["beta"], w_packed, b_packed)

    # ---- pass 2: flash-style attention + gating + output projection ----
    tq = _pick_tile(N)
    tk = _pick_tile(N)
    attn_kernel = functools.partial(_attn_kernel, n_heads=n_heads,
                                    head_dim=D, dv=dv)
    fixed3 = lambda shape: pl.BlockSpec(shape, lambda b, qi, ki: (0,) * len(shape))
    out = pl.pallas_call(
        attn_kernel,
        out_shape=jax.ShapeDtypeStruct((B, N, C_pad), x.dtype),
        grid_spec=pltpu.PrefetchScalarGridSpec(
            num_scalar_prefetch=0,
            grid=(B, N // tq, N // tk),
            in_specs=[
                pl.BlockSpec((1, 1, tq), lambda b, qi, ki: (b, 0, qi)),   # mask rows
                pl.BlockSpec((1, 1, tk), lambda b, qi, ki: (b, 0, ki)),   # mask cols
                pl.BlockSpec((tq, tk), lambda b, qi, ki: (qi, ki)),       # pos bias
                pl.BlockSpec((1, tq, HD), lambda b, qi, ki: (b, qi, 0)),  # q
                pl.BlockSpec((1, tk, HD), lambda b, qi, ki: (b, ki, 0)),  # k
                pl.BlockSpec((1, tk, E), lambda b, qi, ki: (b, ki, 0)),   # v
                pl.BlockSpec((1, tq, E), lambda b, qi, ki: (b, qi, 0)),   # gate
                fixed3((E, C_pad)),                                       # W_out
                fixed3((1, C_pad)),                                       # b_out
                pl.BlockSpec(memory_space=pltpu.MemorySpace.SMEM),        # temperature
            ],
            out_specs=pl.BlockSpec((1, tq, C_pad),
                                   lambda b, qi, ki: (b, qi, 0)),
            scratch_shapes=[
                pltpu.VMEM((n_heads, tq, 1), f32),    # running max
                pltpu.VMEM((n_heads, tq, 1), f32),    # running denominator
                pltpu.VMEM((n_heads, tq, dv), f32),   # running numerator (head-major)
            ],
        ),
        compiler_params=pltpu.CompilerParams(
            dimension_semantics=("parallel", "parallel", "arbitrary")),
    )(mask, mask, pos, q_a, k_a, v_a, gate_a, w_out, b_out,
      params["temp"].astype(f32))

    return out[..., :C] if C_pad != C else out


# -----------------------------------------------------------------------------
# Plain-JAX mirror of the PyTorch forward (eval mode) for the sanity check.
# -----------------------------------------------------------------------------
def _reference(x, mask, pos, params, *, n_heads, head_dim, expansion_factor):
    B, N, C = x.shape
    E = C * expansion_factor
    dv = E // n_heads
    D = head_dim
    hi = jax.lax.Precision.HIGHEST

    mu = jnp.mean(x, -1, keepdims=True)
    var = jnp.mean((x - mu) ** 2, -1, keepdims=True)
    xn = (x - mu) * jax.lax.rsqrt(var + 1e-5) * params["gamma"] + params["beta"]

    silu = lambda z: z * jax.nn.sigmoid(z)
    vg = silu(jnp.einsum("bnc,ec->bne", xn, params["w_vg"], precision=hi)
              + params["b_vg"])
    v, gate = vg[..., :E], vg[..., E:]
    v = v.reshape(B, N, n_heads, dv).transpose(0, 2, 1, 3)            # b h n d
    qk = silu(jnp.einsum("bnc,ec->bne", xn, params["w_qk"], precision=hi)
              + params["b_qk"])
    qk = qk.reshape(B, N, n_heads, 2 * D).transpose(0, 2, 1, 3)       # b h n 2D
    q, k = qk[..., :D], qk[..., D:]
    l2n = lambda t: t / jnp.maximum(
        jnp.sqrt(jnp.sum(t * t, -1, keepdims=True)), 1e-12)
    q, k = l2n(q), l2n(k)
    dots = jnp.einsum("bhid,bhjd->bhij", q, k, precision=hi) * params["temp"][0, 0]
    dots = dots + pos
    keep = (mask[:, 0, :] == 0.0)
    amask = jnp.logical_not(keep[:, None, :, None] & keep[:, None, None, :])
    dots = jnp.where(amask, -jnp.finfo(jnp.float32).max, dots)
    attn = jax.nn.softmax(dots, axis=-1)
    out = jnp.einsum("bhij,bhjd->bhid", attn, v, precision=hi)
    out = out.transpose(0, 2, 1, 3).reshape(B, N, E)
    out = out * gate
    return jnp.einsum("bne,ce->bnc", out, params["w_out"],
                      precision=hi) + params["b_out"]


if __name__ == "__main__":
    B, N = 2, 16
    n_feats, head_dim, n_heads, expansion_factor = 32, 32, 2, 2
    E = n_feats * expansion_factor
    H2D = 2 * n_heads * head_dim

    key = jax.random.PRNGKey(0)
    ks = jax.random.split(key, 8)

    x = jax.random.normal(ks[0], (B, N, n_feats), jnp.float32)
    mask = jnp.zeros((B, 1, N), jnp.float32)          # module default: no padding

    # pos_fn: deterministic additive positional bias of shape (N, N)
    def pos_fn(n, k):
        return jax.random.normal(k, (n, n), jnp.float32) * 0.02
    pos = pos_fn(N, ks[1])

    params = {
        "gamma": jnp.ones((1, n_feats), jnp.float32),
        "beta": jnp.zeros((1, n_feats), jnp.float32),
        "w_vg": jax.random.normal(ks[2], (2 * E, n_feats), jnp.float32)
                * (1.0 / jnp.sqrt(n_feats)),
        "b_vg": jax.random.normal(ks[3], (1, 2 * E), jnp.float32) * 0.02,
        "w_qk": jax.random.normal(ks[4], (H2D, n_feats), jnp.float32)
                * (1.0 / jnp.sqrt(n_feats)),
        "b_qk": jax.random.normal(ks[5], (1, H2D), jnp.float32) * 0.02,
        "w_out": jax.random.normal(ks[6], (n_feats, E), jnp.float32)
                 * (1.0 / jnp.sqrt(E)),
        "b_out": jax.random.normal(ks[7], (1, n_feats), jnp.float32) * 0.02,
        "temp": jnp.full((1, 1), 15.5, jnp.float32),
    }

    out = cosine_gau_forward(x, mask, pos, params, n_heads=n_heads,
                             head_dim=head_dim,
                             expansion_factor=expansion_factor)
    out = jax.block_until_ready(out)

    ref = _reference(x, mask, pos, params, n_heads=n_heads, head_dim=head_dim,
                     expansion_factor=expansion_factor)
    assert out.shape == (B, N, n_feats)
    assert bool(jnp.all(jnp.isfinite(out)))
    # bf16 MXU operands (f32 accumulation) vs an f32-HIGHEST reference:
    # slightly looser tolerance than pure-f32.
    assert bool(jnp.allclose(out, ref, atol=3e-2, rtol=3e-2)), \
        float(jnp.max(jnp.abs(out - ref)))
    assert float(jnp.mean(jnp.abs(out - ref))) < 1e-2

    print("KERNEL_OK")
</pallas_src>

<mosaic_0001>
module attributes {stable_mosaic.version = 11 : i64} {
  func.func @_proj_kernel(%arg0: i32, %arg1: i32, %arg2: memref<1x16x32xf32, #tpu.memory_space<vmem>>, %arg3: memref<1x32xf32, #tpu.memory_space<vmem>>, %arg4: memref<1x32xf32, #tpu.memory_space<vmem>>, %arg5: memref<32x256xbf16, #tpu.memory_space<vmem>>, %arg6: memref<1x256xf32, #tpu.memory_space<vmem>>, %arg7: memref<1x16x64xbf16, #tpu.memory_space<vmem>>, %arg8: memref<1x16x64xbf16, #tpu.memory_space<vmem>>, %arg9: memref<1x16x64xbf16, #tpu.memory_space<vmem>>, %arg10: memref<1x16x64xbf16, #tpu.memory_space<vmem>>) attributes {dimension_semantics = [#tpu.dimension_semantics<parallel>, #tpu.dimension_semantics<parallel>], iteration_bounds = array<i64: 2, 1>, scalar_prefetch = 0 : i64, scratch_operands = 0 : i64, tpu.core_type = #tpu.core_type<tc>, window_params = [{transform_indices = @transform_0, window_bounds = array<i64: 1, 16, 32>}, {pipeline_mode = #tpu.pipeline_mode<synchronous>, transform_indices = @transform_1, window_bounds = array<i64: 1, 32>}, {pipeline_mode = #tpu.pipeline_mode<synchronous>, transform_indices = @transform_2, window_bounds = array<i64: 1, 32>}, {pipeline_mode = #tpu.pipeline_mode<synchronous>, transform_indices = @transform_3, window_bounds = array<i64: 32, 256>}, {pipeline_mode = #tpu.pipeline_mode<synchronous>, transform_indices = @transform_4, window_bounds = array<i64: 1, 256>}, {transform_indices = @transform_5, window_bounds = array<i64: 1, 16, 64>}, {transform_indices = @transform_6, window_bounds = array<i64: 1, 16, 64>}, {transform_indices = @transform_7, window_bounds = array<i64: 1, 16, 64>}, {transform_indices = @transform_8, window_bounds = array<i64: 1, 16, 64>}]} {
    %c0 = arith.constant 0 : index
    %c0_0 = arith.constant 0 : index
    %c0_1 = arith.constant 0 : index
    %0 = vector.load %arg2[%c0, %c0_0, %c0_1] : memref<1x16x32xf32, #tpu.memory_space<vmem>>, vector<1x16x32xf32>
    %1 = vector.shape_cast %0 : vector<1x16x32xf32> to vector<16x32xf32>
    %cst = arith.constant dense<0.000000e+00> : vector<16xf32>
    %2 = vector.multi_reduction <add>, %1, %cst [1] : vector<16x32xf32> to vector<16xf32>
    %3 = vector.shape_cast %2 : vector<16xf32> to vector<16x1xf32>
    %cst_2 = arith.constant 3.200000e+01 : f32
    %4 = vector.broadcast %cst_2 : f32 to vector<16x1xf32>
    %5 = arith.divf %3, %4 : vector<16x1xf32>
    %6 = vector.broadcast %5 : vector<16x1xf32> to vector<16x32xf32>
    %7 = arith.subf %1, %6 : vector<16x32xf32>
    %8 = arith.mulf %7, %7 : vector<16x32xf32>
    %cst_3 = arith.constant dense<0.000000e+00> : vector<16xf32>
    %9 = vector.multi_reduction <add>, %8, %cst_3 [1] : vector<16x32xf32> to vector<16xf32>
    %10 = vector.shape_cast %9 : vector<16xf32> to vector<16x1xf32>
    %cst_4 = arith.constant 3.200000e+01 : f32
    %11 = vector.broadcast %cst_4 : f32 to vector<16x1xf32>
    %12 = arith.divf %10, %11 : vector<16x1xf32>
    %13 = vector.broadcast %5 : vector<16x1xf32> to vector<16x32xf32>
    %14 = arith.subf %1, %13 : vector<16x32xf32>
    %cst_5 = arith.constant 9.99999974E-6 : f32
    %15 = vector.broadcast %cst_5 : f32 to vector<16x1xf32>
    %16 = arith.addf %12, %15 : vector<16x1xf32>
    %17 = math.rsqrt %16 : vector<16x1xf32>
    %18 = vector.broadcast %17 : vector<16x1xf32> to vector<16x32xf32>
    %19 = arith.mulf %14, %18 : vector<16x32xf32>
    %c0_6 = arith.constant 0 : index
    %c0_7 = arith.constant 0 : index
    %20 = vector.load %arg3[%c0_6, %c0_7] : memref<1x32xf32, #tpu.memory_space<vmem>>, vector<1x32xf32>
    %21 = vector.broadcast %20 : vector<1x32xf32> to vector<16x32xf32>
    %22 = arith.mulf %19, %21 : vector<16x32xf32>
    %c0_8 = arith.constant 0 : index
    %c0_9 = arith.constant 0 : index
    %23 = vector.load %arg4[%c0_8, %c0_9] : memref<1x32xf32, #tpu.memory_space<vmem>>, vector<1x32xf32>
    %24 = vector.broadcast %23 : vector<1x32xf32> to vector<16x32xf32>
    %25 = arith.addf %22, %24 : vector<16x32xf32>
    %26 = arith.truncf %25 : vector<16x32xf32> to vector<16x32xbf16>
    %c0_10 = arith.constant 0 : index
    %c0_11 = arith.constant 0 : index
    %27 = vector.load %arg5[%c0_10, %c0_11] : memref<32x256xbf16, #tpu.memory_space<vmem>>, vector<32x256xbf16>
    %cst_12 = arith.constant dense<0.000000e+00> : vector<16x256xf32>
    %28 = tpu.matmul %26, %27, %cst_12 {dimension_numbers = #tpu.dot_dimension_numbers<[1], [0], [0], [1], [0, 0, 1, 1], [], []>} : vector<16x32xbf16>, vector<32x256xbf16>, vector<16x256xf32> -> vector<16x256xf32>
    %c0_13 = arith.constant 0 : index
    %c0_14 = arith.constant 0 : index
    %29 = vector.load %arg6[%c0_13, %c0_14] : memref<1x256xf32, #tpu.memory_space<vmem>>, vector<1x256xf32>
    %30 = vector.broadcast %29 : vector<1x256xf32> to vector<16x256xf32>
    %31 = arith.addf %28, %30 : vector<16x256xf32>
    %32 = arith.negf %31 : vector<16x256xf32>
    %33 = math.exp %32 : vector<16x256xf32>
    %cst_15 = arith.constant 1.000000e+00 : f32
    %34 = vector.broadcast %cst_15 : f32 to vector<16x256xf32>
    %35 = arith.addf %34, %33 : vector<16x256xf32>
    %36 = arith.divf %34, %35 : vector<16x256xf32>
    %37 = arith.mulf %31, %36 : vector<16x256xf32>
    %38 = vector.extract_strided_slice %37 {offsets = [0, 0], sizes = [16, 64], strides = [1, 1]} : vector<16x256xf32> to vector<16x64xf32>
    %39 = vector.extract_strided_slice %37 {offsets = [0, 64], sizes = [16, 64], strides = [1, 1]} : vector<16x256xf32> to vector<16x64xf32>
    %40 = vector.extract_strided_slice %37 {offsets = [0, 128], sizes = [16, 64], strides = [1, 1]} : vector<16x256xf32> to vector<16x64xf32>
    %41 = vector.extract_strided_slice %37 {offsets = [0, 192], sizes = [16, 64], strides = [1, 1]} : vector<16x256xf32> to vector<16x64xf32>
    %42 = arith.truncf %38 : vector<16x64xf32> to vector<16x64xbf16>
    %c0_16 = arith.constant 0 : index
    %c0_17 = arith.constant 0 : index
    %c0_18 = arith.constant 0 : index
    %43 = vector.load %arg7[%c0_16, %c0_17, %c0_18] : memref<1x16x64xbf16, #tpu.memory_space<vmem>>, vector<1x16x64xbf16>
    %44 = vector.shape_cast %43 : vector<1x16x64xbf16> to vector<16x64xbf16>
    %45 = vector.shape_cast %42 : vector<16x64xbf16> to vector<1x16x64xbf16>
    tpu.vector_store %arg7[%c0_16, %c0_17, %c0_18], %45 {strides = array<i32>} : memref<1x16x64xbf16, #tpu.memory_space<vmem>>, vector<1x16x64xbf16>,
    %46 = arith.truncf %39 : vector<16x64xf32> to vector<16x64xbf16>
    %c0_19 = arith.constant 0 : index
    %c0_20 = arith.constant 0 : index
    %c0_21 = arith.constant 0 : index
    %47 = vector.load %arg8[%c0_19, %c0_20, %c0_21] : memref<1x16x64xbf16, #tpu.memory_space<vmem>>, vector<1x16x64xbf16>
    %48 = vector.shape_cast %47 : vector<1x16x64xbf16> to vector<16x64xbf16>
    %49 = vector.shape_cast %46 : vector<16x64xbf16> to vector<1x16x64xbf16>
    tpu.vector_store %arg8[%c0_19, %c0_20, %c0_21], %49 {strides = array<i32>} : memref<1x16x64xbf16, #tpu.memory_space<vmem>>, vector<1x16x64xbf16>,
    %50 = vector.extract_strided_slice %40 {offsets = [0, 0], sizes = [16, 32], strides = [1, 1]} : vector<16x64xf32> to vector<16x32xf32>
    %51 = arith.mulf %50, %50 : vector<16x32xf32>
    %cst_22 = arith.constant dense<0.000000e+00> : vector<16xf32>
    %52 = vector.multi_reduction <add>, %51, %cst_22 [1] : vector<16x32xf32> to vector<16xf32>
    %53 = vector.shape_cast %52 : vector<16xf32> to vector<16x1xf32>
    %cst_23 = arith.constant 1.000000e-24 : f32
    %54 = vector.broadcast %cst_23 : f32 to vector<16x1xf32>
    %55 = arith.maximumf %53, %54 : vector<16x1xf32>
    %56 = math.rsqrt %55 : vector<16x1xf32>
    %57 = vector.broadcast %56 : vector<16x1xf32> to vector<16x32xf32>
    %58 = arith.mulf %50, %57 : vector<16x32xf32>
    %59 = vector.extract_strided_slice %40 {offsets = [0, 32], sizes = [16, 32], strides = [1, 1]} : vector<16x64xf32> to vector<16x32xf32>
    %60 = arith.mulf %59, %59 : vector<16x32xf32>
    %cst_24 = arith.constant dense<0.000000e+00> : vector<16xf32>
    %61 = vector.multi_reduction <add>, %60, %cst_24 [1] : vector<16x32xf32> to vector<16xf32>
    %62 = vector.shape_cast %61 : vector<16xf32> to vector<16x1xf32>
    %cst_25 = arith.constant 1.000000e-24 : f32
    %63 = vector.broadcast %cst_25 : f32 to vector<16x1xf32>
    %64 = arith.maximumf %62, %63 : vector<16x1xf32>
    %65 = math.rsqrt %64 : vector<16x1xf32>
    %66 = vector.broadcast %65 : vector<16x1xf32> to vector<16x32xf32>
    %67 = arith.mulf %59, %66 : vector<16x32xf32>
    %68 = tpu.concatenate %58, %67 in 1 : vector<16x32xf32>, vector<16x32xf32> -> vector<16x64xf32>
    %69 = arith.truncf %68 : vector<16x64xf32> to vector<16x64xbf16>
    %c0_26 = arith.constant 0 : index
    %c0_27 = arith.constant 0 : index
    %c0_28 = arith.constant 0 : index
    %70 = vector.load %arg9[%c0_26, %c0_27, %c0_28] : memref<1x16x64xbf16, #tpu.memory_space<vmem>>, vector<1x16x64xbf16>
    %71 = vector.shape_cast %70 : vector<1x16x64xbf16> to vector<16x64xbf16>
    %72 = vector.shape_cast %69 : vector<16x64xbf16> to vector<1x16x64xbf16>
    tpu.vector_store %arg9[%c0_26, %c0_27, %c0_28], %72 {strides = array<i32>} : memref<1x16x64xbf16, #tpu.memory_space<vmem>>, vector<1x16x64xbf16>,
    %73 = vector.extract_strided_slice %41 {offsets = [0, 0], sizes = [16, 32], strides = [1, 1]} : vector<16x64xf32> to vector<16x32xf32>
    %74 = arith.mulf %73, %73 : vector<16x32xf32>
    %cst_29 = arith.constant dense<0.000000e+00> : vector<16xf32>
    %75 = vector.multi_reduction <add>, %74, %cst_29 [1] : vector<16x32xf32> to vector<16xf32>
    %76 = vector.shape_cast %75 : vector<16xf32> to vector<16x1xf32>
    %cst_30 = arith.constant 1.000000e-24 : f32
    %77 = vector.broadcast %cst_30 : f32 to vector<16x1xf32>
    %78 = arith.maximumf %76, %77 : vector<16x1xf32>
    %79 = math.rsqrt %78 : vector<16x1xf32>
    %80 = vector.broadcast %79 : vector<16x1xf32> to vector<16x32xf32>
    %81 = arith.mulf %73, %80 : vector<16x32xf32>
    %82 = vector.extract_strided_slice %41 {offsets = [0, 32], sizes = [16, 32], strides = [1, 1]} : vector<16x64xf32> to vector<16x32xf32>
    %83 = arith.mulf %82, %82 : vector<16x32xf32>
    %cst_31 = arith.constant dense<0.000000e+00> : vector<16xf32>
    %84 = vector.multi_reduction <add>, %83, %cst_31 [1] : vector<16x32xf32> to vector<16xf32>
    %85 = vector.shape_cast %84 : vector<16xf32> to vector<16x1xf32>
    %cst_32 = arith.constant 1.000000e-24 : f32
    %86 = vector.broadcast %cst_32 : f32 to vector<16x1xf32>
    %87 = arith.maximumf %85, %86 : vector<16x1xf32>
    %88 = math.rsqrt %87 : vector<16x1xf32>
    %89 = vector.broadcast %88 : vector<16x1xf32> to vector<16x32xf32>
    %90 = arith.mulf %82, %89 : vector<16x32xf32>
    %91 = tpu.concatenate %81, %90 in 1 : vector<16x32xf32>, vector<16x32xf32> -> vector<16x64xf32>
    %92 = arith.truncf %91 : vector<16x64xf32> to vector<16x64xbf16>
    %c0_33 = arith.constant 0 : index
    %c0_34 = arith.constant 0 : index
    %c0_35 = arith.constant 0 : index
    %93 = vector.load %arg10[%c0_33, %c0_34, %c0_35] : memref<1x16x64xbf16, #tpu.memory_space<vmem>>, vector<1x16x64xbf16>
    %94 = vector.shape_cast %93 : vector<1x16x64xbf16> to vector<16x64xbf16>
    %95 = vector.shape_cast %92 : vector<16x64xbf16> to vector<1x16x64xbf16>
    tpu.vector_store %arg10[%c0_33, %c0_34, %c0_35], %95 {strides = array<i32>} : memref<1x16x64xbf16, #tpu.memory_space<vmem>>, vector<1x16x64xbf16>,
    return
  }
  func.func @transform_0(%arg0: i32, %arg1: i32) -> (i32, i32, i32) {
    %c0_i32 = arith.constant 0 : i32
    %c0_i32_0 = arith.constant 0 : i32
    return %arg0, %arg1, %c0_i32 : i32, i32, i32
  }
  func.func @transform_1(%arg0: i32, %arg1: i32) -> (i32, i32) {
    %c0_i32 = arith.constant 0 : i32
    %c0_i32_0 = arith.constant 0 : i32
    %c0_i32_1 = arith.constant 0 : i32
    return %c0_i32, %c0_i32_0 : i32, i32
  }
  func.func @transform_2(%arg0: i32, %arg1: i32) -> (i32, i32) {
    %c0_i32 = arith.constant 0 : i32
    %c0_i32_0 = arith.constant 0 : i32
    %c0_i32_1 = arith.constant 0 : i32
    return %c0_i32, %c0_i32_0 : i32, i32
  }
  func.func @transform_3(%arg0: i32, %arg1: i32) -> (i32, i32) {
    %c0_i32 = arith.constant 0 : i32
    %c0_i32_0 = arith.constant 0 : i32
    %c0_i32_1 = arith.constant 0 : i32
    return %c0_i32, %c0_i32_0 : i32, i32
  }
  func.func @transform_4(%arg0: i32, %arg1: i32) -> (i32, i32) {
    %c0_i32 = arith.constant 0 : i32
    %c0_i32_0 = arith.constant 0 : i32
    %c0_i32_1 = arith.constant 0 : i32
    return %c0_i32, %c0_i32_0 : i32, i32
  }
  func.func @transform_5(%arg0: i32, %arg1: i32) -> (i32, i32, i32) {
    %c0_i32 = arith.constant 0 : i32
    %c0_i32_0 = arith.constant 0 : i32
    return %arg0, %arg1, %c0_i32 : i32, i32, i32
  }
  func.func @transform_6(%arg0: i32, %arg1: i32) -> (i32, i32, i32) {
    %c0_i32 = arith.constant 0 : i32
    %c0_i32_0 = arith.constant 0 : i32
    return %arg0, %arg1, %c0_i32 : i32, i32, i32
  }
  func.func @transform_7(%arg0: i32, %arg1: i32) -> (i32, i32, i32) {
    %c0_i32 = arith.constant 0 : i32
    %c0_i32_0 = arith.constant 0 : i32
    return %arg0, %arg1, %c0_i32 : i32, i32, i32
  }
  func.func @transform_8(%arg0: i32, %arg1: i32) -> (i32, i32, i32) {
    %c0_i32 = arith.constant 0 : i32
    %c0_i32_0 = arith.constant 0 : i32
    return %arg0, %arg1, %c0_i32 : i32, i32, i32
  }
}

</mosaic_0001>

<bundles_post_ra>
// kernel: tpu_custom_call.1
= control target key start
LH: loop header
LB: loop body
LE: loop exit
PB: predicated region body
PF: predicated region fallthrough
CT: control target
= control target key end

     0   :  { %s2036_s0 = inlined_call_operand.hbm [shape: f32[2,16,32], index: 0, kind: input, shape index: {}]   ;;  %s2037_s1 = inlined_call_operand.hbm [shape: f32[1,32], index: 1, kind: input, shape index: {}]   ;;  %s2038_s2 = inlined_call_operand.vmem [shape: f32[1,32], index: 2, kind: input, shape index: {}]   ;;  %s2039_s3 = inlined_call_operand.hbm [shape: bf16[32,256], index: 3, kind: input, shape index: {}]   ;;  %s2040_s4 = inlined_call_operand.vmem [shape: f32[1,256], index: 4, kind: input, shape index: {}]   ;;  %s2041_s5 = inlined_call_operand.hbm [shape: bf16[2,16,64], index: 5, kind: output, shape index: {0}]   ;;  %s2042_s6 = inlined_call_operand.hbm [shape: bf16[2,16,64], index: 6, kind: output, shape index: {1}]   ;;  %s2043_s7 = inlined_call_operand.hbm [shape: bf16[2,16,64], index: 7, kind: output, shape index: {2}]   ;;  %s2044_s8 = inlined_call_operand.hbm [shape: bf16[2,16,64], index: 8, kind: output, shape index: {3}]  }
   0x1   :  { %2051 = sst [smem:[#allocation22_spill]] %s2037_s1 }
   0x2   :  { %2052 = sst [smem:[#allocation23_spill]] %s2039_s3 }
   0x3   :  { %2053 = sst [smem:[#allocation24_spill]] %s2044_s8 }
   0x4   :  { %14 = vsyncpa [#allocation3], 0 }
   0x5   :  { %16 = vsyncpa [#allocation3 + $0x1], 0 }
   0x6   :  { %17 = vsyncpa [#allocation6], 0 }
   0x7   :  { %18 = vsyncpa [#allocation4], 0 }
   0x8   :  { %20 = vsyncpa [#allocation4 + $0x1], 0 }
   0x9   :  { %21 = vsyncpa [#allocation10], 0 }
   0xa   :  { %23 = vsyncpa [#allocation10 + $0x1], 0 }
   0xb   :  { %24 = vsyncpa [#allocation13], 0 }
   0xc   :  { %26 = vsyncpa [#allocation13 + $0x1], 0  ;;  %s1650_s27 = smov 0   ;;  %s1652_s28 = smov 0  }
   0xd   :  { %s1654_s29 = smov 0   ;;  %s1656_s30 = smov 0  }
   0xe   :  { %s1658_s9 = smov 0   ;;  %s1660_s10 = smov 0  }
   0xf LB: > { %2054 = sst [smem:[#allocation19_spill]] %s1574_s27  ;;  %s1681_s11 = sadd.s32 4294967295, %s1594_s10   ;;  %s1594_s10 = sphi %s1660_s10, %s32_s10   ;;  %s1590_s9 = sphi %s1658_s9, %s2079_s9   ;;  %s1586_s30 = sphi %s1656_s30, %s2078_s30   ;;  %s1582_s29 = sphi %s1654_s29, %s2077_s29   ;;  %s1578_s28 = sphi %s1652_s28, %s2076_s28   ;;  %s1574_s27 = sphi %s1650_s27, %s2075_s27  }
  0x10   : > { %2055 = sst [smem:[#allocation20_spill]] %s1594_s10  ;;  %s2045_s12 = sadd.s32 4294967294, %s1594_s10  }
  0x11   : > { %p60_p0 = scmp.ne.s32.totalorder %s1582_s29, %s1578_s28  ;;  %p61_p1 = scmp.eq.s32.totalorder %s1594_s10, 0 }
  0x12   : > { %p66_p2 = scmp.ne.s32.totalorder %s1578_s28, %s1574_s27  ;;  %p67_p3 = scmp.eq.s32.totalorder %s1681_s11, 0 }
  0x13   : > { %p176_p4 = scmp.eq.s32.totalorder %s1681_s11, 1  ;;  %p1692_p5 = por %p61_p1, %p60_p0 }
  0x14   : > { %p182_p6 = scmp.eq.s32.totalorder %s2045_s12, 1  ;;  %p1700_p7 = por %p67_p3, %p66_p2 }
  0x15   : > { %p1704_p8 = por %p176_p4, %p60_p0  ;;  %p1111_p10 = scmp.ge.s32.totalorder %s1594_s10, 1 }
  0x16   : > { %p1708_p9 = por %p182_p6, %p66_p2  ;;  %p273_p11 = scmp.lt.s32.totalorder %s1594_s10, 3 }
  0x17   : > { %s2061_s1 = sld [smem:[#allocation22_spill]]  ;;  %s1596_s22 = smov [#allocation5]  }
  0x18   : > { %s2059_s17 = scalar_select %p1708_p9, 1, 0 }
  0x19   : > { %p1717_p12 = pnand %p1111_p10, %p273_p11  ;;  %s287_s23 = sshll.u32 %s1596_s22, 4  ;;  %s288_s23 = int_to_ptr.vmem [resolvable:$true] %s287_s23 }
  0x1a   : > { %2060 = sst [smem:[#allocation21_spill]] %s2059_s17  ;;  %p1114_p13 = scmp.ge.s32.totalorder %s1594_s10, 2 }
  0x1b   : > { %p1189_p0 = pneg %p1717_p12  ;;  %p1215_p1 = scmp.lt.s32.totalorder %s1594_s10, 2 }
  0x1c   : > { %s2063_s3 = sld [smem:[#allocation23_spill]]  ;;  %s1597_s19 = smov [#allocation7]  }
  0x1d   : > { %s285_s20 = sshll.u32 %s2061_s1, 4  ;;  %p1190_p2 = pnand %p1189_p0, %p67_p3  ;;  %s286_s20 = int_to_ptr.hbm [resolvable:$true] %s285_s20 }
  0x1e   : > { %p1732_p4 = pnand %p1215_p1, %p1692_p5  ;;  %s301_s22 = sshll.u32 %s1597_s19, 4  ;;  %s302_s22 = int_to_ptr.vmem [resolvable:$true] %s301_s22 }
  0x1f   : > { %1192 = dma.hbm_to_vmem [thread:$0]  (!%p1190_p2), %s286_s20, 16, %s288_s23, [#allocation6]  }
  0x20   : > { %s1598_s12 = smov 128   ;;  %s1599_s13 = smov 8  }
  0x21   : > { %s318_s24 = sand.u32 1, %s1582_s29   ;;  %s44_s25 = sadd.s32 1, %s1590_s9 }
  0x22   : > { %s299_s26 = sshll.u32 %s2063_s3, 4  ;;  %s1115_s1 = sshll.u32 %s318_s24, 4  ;;  %s300_s26 = int_to_ptr.hbm [resolvable:$true] %s299_s26 }
  0x23   : > { %1195 = dma.hbm_to_vmem [thread:$0]  (!%p1190_p2), %s300_s26, 512, %s302_s22, [#allocation6], %s1598_s12, %s1598_s12, %s1599_s13  }
  0x24   : > { %p46_p6 = scmp.ge.s32.totalorder %s44_s25, 2  ;;  %s1162_s14 = sshll.u32 %s1590_s9, 4 }
  0x25   : > { %s322_s3 = scalar_lea.vmem [#allocation2], %s1115_s1  ;;  %s329_s20 = scalar_lea.hbm %s2036_s0, %s1162_s14 }
  0x26   : > { %s332_s10 = sshll.u32 %s322_s3, 4  ;;  %s2081_s25 = smov (%p46_p6, %s44_s25), 0  ;;  %s333_s10 = int_to_ptr.vmem [resolvable:$true] %s332_s10 }
  0x27   : > { %s48_s23 = ssub.s32 %s1590_s9, %s2081_s25  ;;  %s330_s26 = sshll.u32 %s329_s20, 4  ;;  %s331_s26 = int_to_ptr.hbm [resolvable:$true] %s330_s26 }
  0x28   : > { %p51_p5 = scmp.eq.s32.totalorder %s48_s23, 0  ;;  %s319_s22 = scalar_lea.sflag [#allocation3], %s318_s24 }
  0x29   : > { %1199 = dma.hbm_to_vmem [thread:$0]  (!%p1732_p4), %s331_s26, 256, %s333_s10, %s319_s22, %s1598_s12, %s1598_s12, %s1599_s13  }
  0x2a   : > { %s2065_s27 = sadd.s32 1, %s1582_s29  ;;  %344 = sbr.rel (%p1717_p12) target bundleno = 891 (0x37b), region = 40 }
  0x2b   : > { %s1751_s8 = scalar_select %p51_p5, %s1582_s29, %s2065_s27  }
  0x2c   : > { %s1756_s1 = sand.u32 (!%p1717_p12), 1, %s1578_s28  }
  0x2d   : > { %s1119_s3 = sshll.u32 (!%p1717_p12), %s1756_s1, 4  ;;  %s347_s17 = scalar_lea.sflag (!%p1717_p12), [#allocation3], %s1756_s1 }
  0x2e   : > { %s350_s14 = scalar_lea.vmem (!%p1717_p12), [#allocation2], %s1119_s3 }
  0x2f   : > { %1553 = dma.done.wait (%p1700_p7), %s347_s17, 256  }
  0x30   : > { %1555 = vsyncadd (%p1700_p7), %s347_s17, 4294967040 }
  0x31   : > { %1557 = dma.done.wait (%p67_p3), [#allocation6], 528  }
  0x32   : > { %1559 = vsyncadd (%p67_p3), [#allocation6], 4294966768  ;;  %vm417_vm0 = vcmask 261120   ;;  %v415_v0 = vld [vmem:[%s350_s14] sm:$0xff]  ;;  %v416_v2 = vld [vmem:[%s350_s14 + $0x8] sm:$0xff]  ;;  %v1600_v4 = vmov 32.0  }
  0x33   : > { %v418_v1 = vsel %vm417_vm0, %v415_v0, 0.0  ;;  %v421_v3 = vsel %vm417_vm0, %v416_v2, 0.0  ;;  %1288 = vrcp.f32 %v1600_v4  ;;  %v1136_v21 = vld [vmem:[#allocation7 + $0x10] sm:$0xf]  ;;  %v1166_v22 = vld [vmem:[#allocation7 + $0x14] sm:$0xf0] }
  0x34   : > { %419 = vadd.xlane.f32.xlu0 %v418_v1  ;;  %v1165_v23 = vld [vmem:[#allocation7 + $0x14] sm:$0xf]  ;;  %v1137_v24 = vor.u32 %v1166_v22, %v1136_v21  ;;  %v1138_v25 = vld [vmem:[#allocation7 + $0x18] sm:$0xf0]  ;;  %v1128_v27 = vld [vmem:[#allocation7] sm:$0xf] }
  0x35   : > { %v1141_v26 = vor.u32 %v1165_v23, %v1138_v25  ;;  %v1164_v28 = vld [vmem:[#allocation7 + $0x4] sm:$0xf0]  ;;  %v1163_v29 = vld [vmem:[#allocation7 + $0x4] sm:$0xf]  ;;  %v1130_v32 = vld [vmem:[#allocation7 + $0x8] sm:$0xf0] }
  0x36   : > { %521 = vmatpush.bf16.msra.mxu0 %v1137_v24  ;;  %v1129_v31 = vor.u32 %v1164_v28, %v1128_v27  ;;  %v1133_v34 = vor.u32 %v1163_v29, %v1130_v32  ;;  %v1286_v52 = vld [vmem:[#allocation5] ss:$0 sm:$0xff]  ;;  %s1793_s15 = sshll.u32 %s1756_s1, 3  ;;  %s1601_s18 = smov 32  }
  0x37   : > { %535 = vmatpush.bf16.msra.mxu1 %v1141_v26  ;;  %v1287_v57 = vld [vmem:[%s2038_s2] ss:$0 sm:$0xff]  ;;  %s1804_s21 = scalar_lea.vmem [#allocation8], %s1793_s15  ;;  %s1602_s24 = smov 64  }
  0x38   : > { %v486_v62 = vld [vmem:[%s2040_s4] sm:$0x3]  ;;  %s1603_s19 = smov 96   ;;  %s1826_s20 = scalar_lea.vmem [#allocation9], %s1793_s15 }
  0x39   : > { %v1289_v5 = vpop.eup %1288  ;;  %v488_v63 = vperm.slane %v486_v62, 0  ;;  %s857_s23 = sshll.u32 %s1826_s20, 4  ;;  %s1864_s26 = sshll.u32 %s1586_s30, 3  ;;  %s1868_s23 = int_to_ptr.vmem [resolvable:$true] %s857_s23 }
  0x3a   : > { %v425_v6 = vmul.f32 32.0, %v1289_v5  ;;  %vm429_vm1 = vweird.f32 %v1289_v5  ;;  %522 = vmatpush.bf16.msra.mxu0 %v1129_v31  ;;  %s856_s17 = scalar_lea.hbm %s2042_s6, %s1864_s26  ;;  %s813_s14 = sand.u32 1, %s1681_s11  }
  0x3b   : > { %536 = vmatpush.bf16.msra.mxu1 %v1133_v34  ;;  %s1877_s27 = sshll.u32 %s856_s17, 4  ;;  %s1899_s30 = scalar_lea.sflag [#allocation10], %s813_s14  ;;  %s860_s27 = int_to_ptr.hbm [resolvable:$true] %s1877_s27 }
  0x3c   : > { %422 = vadd.xlane.f32.xlu0 %v421_v3  ;;  %v426_v7 = vsub.f32 1.0, %v425_v6  ;;  %s1430_s11 = sshra.s32 %s860_s27, 4  ;;  %s1431_s11 = int_to_ptr.hbm [resolvable:$true] %s1430_s11 }
  0x3d   : > { %s1432_s10 = scalar_lea.hbm %s1431_s11, 8  ;;  %p1437_p11 = scmp.lt.s32.totalorder %s1431_s11, %s2042_s6 }
  0x3e   : > { %v427_v8 = vmul.f32 %v1289_v5, %v426_v7  ;;  %p1433_p3 = scmp.ne.s32.totalorder %s1431_s11, %s1432_s10 }
  0x40   : > { %v428_v9 = vadd.f32 %v1289_v5, %v427_v8  ;;  %p1434_p7 = pnand %p1433_p3, %p1704_p8 }
  0x42   : > { %v430_v10 = vsel %vm429_vm1, %v1289_v5, %v428_v9  ;;  %vm625_vm1 = vcmask 519168   ;;  %p1435_p10 = pneg %p1434_p7 }
  0xa7   : > { %v420_v11 = vpop.xlane.xlu0 %419 }
  0xa8   : > { %v431_v12 = vmul.f32 %v430_v10, %v420_v11 }
  0xaa   : > { %v433_v13 = vsub.f32 %v415_v0, %v431_v12  ;;  %v489_v0 = vperm.slane %v486_v62, 1 }
  0xac   : > { %v435_v14 = vmul.f32 %v433_v13, %v433_v13 }
  0xae   : > { %v437_v15 = vsel %vm417_vm0, %v435_v14, 0.0 }
  0xaf   : > { %438 = vadd.xlane.f32.xlu1 %v437_v15  ;;  %v423_v16 = vpop.xlane.xlu0 %422 }
  0xb0   : > { %v432_v17 = vmul.f32 %v430_v10, %v423_v16 }
  0xb2   : > { %v434_v18 = vsub.f32 %v416_v2, %v432_v17 }
  0xb4   : > { %v436_v19 = vmul.f32 %v434_v18, %v434_v18 }
  0xb6   : > { %v440_v20 = vsel %vm417_vm0, %v436_v19, 0.0 }
  0xb7   : > { %441 = vadd.xlane.f32.xlu1 %v440_v20 }
 0x122   : > { %v439_v30 = vpop.xlane.xlu1 %438 }
 0x123   : > { %v443_v33 = vmul.f32 %v439_v30, %v430_v10 }
 0x125   : > { %v445_v35 = vadd.f32 1e-05, %v443_v33 }
 0x127   : > { %1290 = vrsqrt.f32 %v445_v35  ;;  %vm453_vm3 = vweird.f32 %v445_v35 }
 0x12a   : > { %v442_v36 = vpop.xlane.xlu1 %441 }
 0x12b   : > { %v444_v37 = vmul.f32 %v442_v36, %v430_v10 }
 0x12d   : > { %v1291_v38 = vpop.eup %1290  ;;  %v446_v39 = vadd.f32 1e-05, %v444_v37 }
 0x12e   : > { %v448_v40 = vmul.f32 %v1291_v38, %v445_v35  ;;  %vm454_vm2 = vweird.f32 %v1291_v38 }
 0x12f   : > { %1292 = vrsqrt.f32 %v446_v39  ;;  %vm455_vm4 = vmor %vm453_vm3, %vm454_vm2  ;;  %vm463_vm6 = vweird.f32 %v446_v39 }
 0x130   : > { %v449_v41 = vmul.f32 %v1291_v38, %v448_v40 }
 0x132   : > { %v450_v42 = vmul.f32 0.5, %v449_v41 }
 0x134   : > { %v451_v43 = vsub.f32 1.5, %v450_v42 }
 0x135   : > { %v1293_v44 = vpop.eup %1292 }
 0x136   : > { %v452_v45 = vmul.f32 %v1291_v38, %v451_v43  ;;  %v458_v46 = vmul.f32 %v1293_v44, %v446_v39  ;;  %vm464_vm5 = vweird.f32 %v1293_v44 }
 0x137   : > { %vm465_vm7 = vmor %vm463_vm6, %vm464_vm5 }
 0x138   : > { %v459_v47 = vmul.f32 %v1293_v44, %v458_v46  ;;  %v456_v48 = vsel %vm455_vm4, %v1291_v38, %v452_v45 }
 0x139   : > { %v467_v51 = vmul.f32 %v456_v48, %v433_v13 }
 0x13a   : > { %v460_v49 = vmul.f32 0.5, %v459_v47 }
 0x13b   : > { %v473_v56 = vmul.f32 %v1286_v52, %v467_v51 }
 0x13c   : > { %v461_v50 = vsub.f32 1.5, %v460_v49 }
 0x13d   : > { %v479_v59 = vadd.f32 %v1287_v57, %v473_v56 }
 0x13e   : > { %v462_v53 = vmul.f32 %v1293_v44, %v461_v50 }
 0x140   : > { %v466_v54 = vsel %vm465_vm7, %v1293_v44, %v462_v53 }
 0x141   : > { %v468_v55 = vmul.f32 %v466_v54, %v434_v18 }
 0x143   : > { %v474_v58 = vmul.f32 %v1286_v52, %v468_v55 }
 0x145   : > { %v480_v60 = vadd.f32 %v1287_v57, %v474_v58 }
 0x147   : > { %v481_v61 = vpack.c.bf16 %v480_v60, %v479_v59 }
 0x149   : > { %1142 = vmatmul.msk.bf16.vlgmr.msra.gmra.mxu0 %vm417_vm0, %v481_v61  ;;  %1143 = vmatmul.msk.bf16.vlgmr.msra.gmra.mxu1 %vm417_vm0, %v481_v61 }
 0x1c6   : > { %v524_v1 = vpop.f32.mrf.mxu0  ;;  %v538_v2 = vpop.f32.mrf.mxu1 }
 0x1c7   : > { %v525_v3 = vadd.f32 %v524_v1, %v488_v63  ;;  %v539_v4 = vadd.f32 %v538_v2, %v489_v0 }
 0x1c9   : > { %v1144_v5 = vmul.f32 -1.442695, %v525_v3  ;;  %v1145_v6 = vmul.f32 -1.442695, %v539_v4 }
 0x1cb   : > { %1294 = vpow2.f32 %v1144_v5 }
 0x1cc   : > { %1296 = vpow2.f32 %v1145_v6 }
 0x1ce   : > { %v526_v7 = vpop.f32.mrf.mxu0  ;;  %v540_v8 = vpop.f32.mrf.mxu1 }
 0x1cf   : > { %v1780_v9 = vadd.f32 %v526_v7, %v488_v63  ;;  %v1782_v10 = vadd.f32 %v540_v8, %v489_v0 }
 0x1d1   : > { %v1295_v11 = vpop.eup %1294  ;;  %v1146_v12 = vmul.f32 -1.442695, %v1780_v9  ;;  %v1147_v15 = vmul.f32 -1.442695, %v1782_v10 }
 0x1d2   : > { %v1297_v13 = vpop.eup %1296  ;;  %v555_v14 = vadd.f32 1.0, %v1295_v11 }
 0x1d3   : > { %v556_v16 = vadd.f32 1.0, %v1297_v13  ;;  %1298 = vpow2.f32 %v1146_v12 }
 0x1d4   : > { %1300 = vrcp.f32 %v555_v14  ;;  %v568_v26 = vand.u32 2147483647, %v555_v14  ;;  %v570_v27 = vand.u32 2147483648, %v555_v14  ;;  %vm564_vm10 = vweird.f32 %v555_v14 }
 0x1d5   : > { %1302 = vrcp.f32 %v556_v16  ;;  %v585_v30 = vand.u32 2147483648, %v556_v16  ;;  %v583_v32 = vand.u32 2147483647, %v556_v16  ;;  %vm579_vm12 = vweird.f32 %v556_v16 }
 0x1d6   : > { %1304 = vpow2.f32 %v1147_v15  ;;  %v571_v35 = vor.u32 1.1754944e-38, %v570_v27  ;;  %vm569_vm13 = vcmp.eq.f32.partialorder %v568_v26, 8.507059e+37 }
 0x1d7   : > { %v586_v38 = vor.u32 1.1754944e-38, %v585_v30  ;;  %vm584_vm15 = vcmp.eq.f32.partialorder %v583_v32, 8.507059e+37 }
 0x1d9   : > { %v1299_v17 = vpop.eup %1298 }
 0x1da   : > { %v1301_v18 = vpop.eup %1300  ;;  %v1786_v19 = vadd.f32 1.0, %v1299_v17 }
 0x1db   : > { %v1303_v20 = vpop.eup %1302  ;;  %v560_v21 = vmul.f32 %v1301_v18, %v555_v14  ;;  %vm565_vm8 = vweird.f32 %v1301_v18 }
 0x1dc   : > { %v1305_v22 = vpop.eup %1304  ;;  %v575_v23 = vmul.f32 %v1303_v20, %v556_v16  ;;  %1306 = vrcp.f32 %v1786_v19  ;;  %vm580_vm9 = vweird.f32 %v1303_v20  ;;  %vm566_vm11 = vmor %vm564_vm10, %vm565_vm8  ;;  %v600_v47 = vand.u32 2147483648, %v1786_v19 }
 0x1dd   : > { %v561_v24 = vsub.f32 1.0, %v560_v21  ;;  %v1789_v25 = vadd.f32 1.0, %v1305_v22  ;;  %vm581_vm14 = vmor %vm579_vm12, %vm580_vm9  ;;  %v598_v51 = vand.u32 2147483647, %v1786_v19  ;;  %vm594_vm3 = vweird.f32 %v1786_v19 }
 0x1de   : > { %v576_v28 = vsub.f32 1.0, %v575_v23  ;;  %v601_v56 = vor.u32 1.1754944e-38, %v600_v47 }
 0x1df   : > { %v562_v29 = vmul.f32 %v1301_v18, %v561_v24  ;;  %1308 = vrcp.f32 %v1789_v25  ;;  %v615_v55 = vand.u32 2147483648, %v1789_v25  ;;  %v613_v58 = vand.u32 2147483647, %v1789_v25 }
 0x1e0   : > { %v577_v31 = vmul.f32 %v1303_v20, %v576_v28  ;;  %vm599_vm6 = vcmp.eq.f32.partialorder %v598_v51, 8.507059e+37  ;;  %vm609_vm7 = vweird.f32 %v1789_v25 }
 0x1e1   : > { %v563_v33 = vadd.f32 %v1301_v18, %v562_v29  ;;  %v616_v63 = vor.u32 1.1754944e-38, %v615_v55  ;;  %vm614_vm9 = vcmp.eq.f32.partialorder %v613_v58, 8.507059e+37 }
 0x1e2   : > { %v1307_v34 = vpop.eup %1306  ;;  %v578_v36 = vadd.f32 %v1303_v20, %v577_v31 }
 0x1e3   : > { %v567_v37 = vsel %vm566_vm11, %v1301_v18, %v563_v33  ;;  %v590_v39 = vmul.f32 %v1307_v34, %v1786_v19  ;;  %vm595_vm2 = vweird.f32 %v1307_v34 }
 0x1e4   : > { %v572_v40 = vsel %vm569_vm13, %v571_v35, %v567_v37  ;;  %v582_v41 = vsel %vm581_vm14, %v1303_v20, %v578_v36  ;;  %vm596_vm4 = vmor %vm594_vm3, %vm595_vm2 }
 0x1e5   : > { %v1309_v42 = vpop.eup %1308  ;;  %v619_v43 = vmul.f32 %v572_v40, %v525_v3  ;;  %v587_v44 = vsel %vm584_vm15, %v586_v38, %v582_v41  ;;  %v591_v45 = vsub.f32 1.0, %v590_v39 }
 0x1e6   : > { %v1796_v46 = vmul.f32 %v587_v44, %v539_v4  ;;  %v605_v48 = vmul.f32 %v1309_v42, %v1789_v25  ;;  %vm610_vm5 = vweird.f32 %v1309_v42 }
 0x1e7   : > { %v623_v49 = vpack.c.bf16 %v619_v43, %v619_v43  ;;  %v592_v50 = vmul.f32 %v1307_v34, %v591_v45  ;;  %vm611_vm8 = vmor %vm609_vm7, %vm610_vm5 }
 0x1e8   : > { %v606_v52 = vsub.f32 1.0, %v605_v48  ;;  %v638_v53 = vmul.f32 %v1796_v46, %v1796_v46 }
 0x1e9   : > { %626 = vst.msk [vmem:[%s1804_s21] sm:$0xf] %vm625_vm1, %v623_v49  ;;  %v593_v54 = vadd.f32 %v1307_v34, %v592_v50 }
 0x1ea   : > { %v607_v57 = vmul.f32 %v1309_v42, %v606_v52  ;;  %750 = vrot.lane.b32.xlu0 %v638_v53, %s1601_s18  ;;  %714 = vrot.lane.b32.xlu2 %v638_v53, %s1602_s24  ;;  %v640_v12 = vsel %vm417_vm0, %v638_v53, 0.0 }
 0x1eb   : > { %v597_v59 = vsel %vm596_vm4, %v1307_v34, %v593_v54 }
 0x1ec   : > { %v602_v60 = vsel %vm599_vm6, %v601_v56, %v597_v59  ;;  %v608_v61 = vadd.f32 %v1309_v42, %v607_v57 }
 0x1ed   : > { %v621_v62 = vmul.f32 %v602_v60, %v1780_v9 }
 0x1ee   : > { %v612_v0 = vsel %vm611_vm8, %v1309_v42, %v608_v61 }
 0x1ef   : > { %v624_v1 = vpack.c.bf16 %v621_v62, %v621_v62  ;;  %v617_v2 = vsel %vm614_vm9, %v616_v63, %v612_v0 }
 0x1f0   : > { %v1815_v3 = vmul.f32 %v617_v2, %v1782_v10 }
 0x1f1   : > { %627 = vst.msk [vmem:[%s1804_s21 + $0x4] sm:$0xf] %vm625_vm1, %v624_v1 }
 0x1f2   : > { %v639_v4 = vmul.f32 %v1815_v3, %v1815_v3 }
 0x1f4   : > { %752 = vrot.lane.b32.xlu1 %v639_v4, %s1601_s18  ;;  %716 = vrot.lane.b32.xlu2 %v639_v4, %s1602_s24  ;;  %v643_v17 = vsel %vm417_vm0, %v639_v4, 0.0  ;;  %s1436_s18 = scalar_lea.hbm %s2042_s6, 16 }
 0x1f5   : > { %p1438_p12 = scmp.lt.s32.totalorder %s1436_s18, %s1432_s10 }
 0x1f7   : > { %p1439_p0 = por %p1438_p12, %p1437_p11 }
 0x1f9   : > { %p1440_p1 = pnand %p1439_p0, %p1435_p10 }
 0x1fc   : > { %630 = vrot.lane.b32.xlu2 %v623_v49, %s1602_s24 }
 0x204   : > { %672 = vrot.lane.b32.xlu2 %v638_v53, %s1603_s19 }
 0x20c   : > { %674 = vrot.lane.b32.xlu2 %v639_v4, %s1603_s19 }
 0x244   : > { %v715_v5 = vpop.permute.xlu2 %714 }
 0x245   : > { %v720_v6 = vsel %vm417_vm0, %v715_v5, 0.0 }
 0x246   : > { %721 = vadd.xlane.f32.xlu0 %v720_v6 }
 0x24e   : > { %v717_v7 = vpop.permute.xlu2 %716 }
 0x24f   : > { %v723_v8 = vsel %vm417_vm0, %v717_v7, 0.0 }
 0x250   : > { %724 = vadd.xlane.f32.xlu2 %v723_v8 }
 0x256   : > { %v631_v9 = vpop.permute.xlu2 %630 }
 0x257   : > { %636 = vst.msk [vmem:[%s1826_s20] sm:$0xf] %vm625_vm1, %v631_v9 }
 0x25c   : > { %v751_v10 = vpop.permute.xlu0 %750 }
 0x25d   : > { %v756_v11 = vsel %vm417_vm0, %v751_v10, 0.0 }
 0x25e   : > { %757 = vadd.xlane.f32.xlu1 %v756_v11  ;;  %v673_v15 = vpop.permute.xlu2 %672 }
 0x25f   : > { %v678_v16 = vsel %vm417_vm0, %v673_v15, 0.0 }
 0x266   : > { %v753_v13 = vpop.permute.xlu1 %752  ;;  %641 = vadd.xlane.f32.xlu1 %v640_v12  ;;  %v675_v18 = vpop.permute.xlu2 %674 }
 0x267   : > { %v759_v14 = vsel %vm417_vm0, %v753_v13, 0.0  ;;  %v681_v19 = vsel %vm417_vm0, %v675_v18, 0.0 }
 0x268   : > { %760 = vadd.xlane.f32.xlu0 %v759_v14  ;;  %632 = vrot.lane.b32.xlu2 %v624_v1, %s1602_s24 }
 0x26e   : > { %679 = vadd.xlane.f32.xlu1 %v678_v16 }
 0x270   : > { %644 = vadd.xlane.f32.xlu0 %v643_v17 }
 0x278   : > { %682 = vadd.xlane.f32.xlu0 %v681_v19 }
 0x2b9   : > { %v722_v20 = vpop.xlane.xlu0 %721 }
 0x2ba   : > { %v726_v21 = vmax.f32 %v722_v20, 1e-24 }
 0x2bc   : > { %1310 = vrsqrt.f32 %v726_v21  ;;  %vm734_vm11 = vweird.f32 %v726_v21 }
 0x2c2   : > { %v1311_v22 = vpop.eup %1310 }
 0x2c3   : > { %v729_v23 = vmul.f32 %v1311_v22, %v726_v21  ;;  %v725_v24 = vpop.xlane.xlu2 %724  ;;  %vm735_vm10 = vweird.f32 %v1311_v22 }
 0x2c4   : > { %v727_v25 = vmax.f32 %v725_v24, 1e-24  ;;  %vm736_vm13 = vmor %vm734_vm11, %vm735_vm10 }
 0x2c5   : > { %v730_v26 = vmul.f32 %v1311_v22, %v729_v23 }
 0x2c6   : > { %1312 = vrsqrt.f32 %v727_v25  ;;  %vm744_vm14 = vweird.f32 %v727_v25 }
 0x2c7   : > { %v731_v27 = vmul.f32 0.5, %v730_v26 }
 0x2c9   : > { %v732_v30 = vsub.f32 1.5, %v731_v27 }
 0x2cb   : > { %v633_v28 = vpop.permute.xlu2 %632  ;;  %v733_v33 = vmul.f32 %v1311_v22, %v732_v30 }
 0x2cc   : > { %v1313_v29 = vpop.eup %1312  ;;  %637 = vst.msk [vmem:[%s1826_s20 + $0x4] sm:$0xf] %vm625_vm1, %v633_v28 }
 0x2cd   : > { %v739_v31 = vmul.f32 %v1313_v29, %v727_v25  ;;  %vm745_vm12 = vweird.f32 %v1313_v29  ;;  %v737_v39 = vsel %vm736_vm13, %v1311_v22, %v733_v33 }
 0x2ce   : > { %vm746_vm15 = vmor %vm744_vm14, %vm745_vm12  ;;  %v748_v41 = vmul.f32 %v737_v39, %v1796_v46 }
 0x2cf   : > { %v740_v32 = vmul.f32 %v1313_v29, %v739_v31 }
 0x2d1   : > { %v741_v34 = vmul.f32 0.5, %v740_v32  ;;  %v758_v35 = vpop.xlane.xlu1 %757 }
 0x2d2   : > { %v762_v36 = vmax.f32 %v758_v35, 1e-24 }
 0x2d3   : > { %v742_v37 = vsub.f32 1.5, %v741_v34 }
 0x2d4   : > { %1314 = vrsqrt.f32 %v762_v36  ;;  %vm770_vm3 = vweird.f32 %v762_v36 }
 0x2d5   : > { %v743_v38 = vmul.f32 %v1313_v29, %v742_v37 }
 0x2d7   : > { %v747_v40 = vsel %vm746_vm15, %v1313_v29, %v743_v38 }
 0x2d8   : > { %v749_v42 = vmul.f32 %v747_v40, %v1815_v3 }
 0x2d9   : > { %v642_v43 = vpop.xlane.xlu1 %641 }
 0x2da   : > { %v1841_v44 = vpop.eup %1314  ;;  %v1843_v45 = vmax.f32 %v642_v43, 1e-24  ;;  %v1276_v47 = vpack.i.bf16 %v749_v42, %v748_v41 }
 0x2db   : > { %v765_v48 = vmul.f32 %v1841_v44, %v762_v36  ;;  %v761_v49 = vpop.xlane.xlu0 %760  ;;  %vm771_vm2 = vweird.f32 %v1841_v44 }
 0x2dc   : > { %v763_v50 = vmax.f32 %v761_v49, 1e-24  ;;  %1316 = vrsqrt.f32 %v1843_v45  ;;  %1277 = vrot.lane.b32.xlu1 %v1276_v47, %s1602_s24  ;;  %vm1881_vm5 = vmor %vm770_vm3, %vm771_vm2 }
 0x2dd   : > { %v766_v51 = vmul.f32 %v1841_v44, %v765_v48 }
 0x2de   : > { %1318 = vrsqrt.f32 %v763_v50  ;;  %vm780_vm6 = vweird.f32 %v763_v50 }
 0x2df   : > { %v767_v52 = vmul.f32 0.5, %v766_v51 }
 0x2e1   : > { %v680_v53 = vpop.xlane.xlu1 %679  ;;  %v768_v60 = vsub.f32 1.5, %v767_v52 }
 0x2e2   : > { %v1849_v54 = vpop.eup %1316  ;;  %v1851_v55 = vmax.f32 %v680_v53, 1e-24 }
 0x2e3   : > { %v649_v56 = vmul.f32 %v1849_v54, %v1843_v45  ;;  %v645_v57 = vpop.xlane.xlu0 %644  ;;  %v769_v1 = vmul.f32 %v1841_v44, %v768_v60 }
 0x2e4   : > { %v1319_v58 = vpop.eup %1318  ;;  %v1855_v59 = vmax.f32 %v645_v57, 1e-24  ;;  %1320 = vrsqrt.f32 %v1851_v55 }
 0x2e5   : > { %v775_v61 = vmul.f32 %v1319_v58, %v763_v50  ;;  %v650_v62 = vmul.f32 %v1849_v54, %v649_v56  ;;  %vm781_vm4 = vweird.f32 %v1319_v58  ;;  %v773_v14 = vsel %vm1881_vm5, %v1841_v44, %v769_v1 }
 0x2e6   : > { %1322 = vrsqrt.f32 %v1855_v59  ;;  %vm1893_vm7 = vmor %vm780_vm6, %vm781_vm4 }
 0x2e7   : > { %v776_v63 = vmul.f32 %v1319_v58, %v775_v61  ;;  %v651_v0 = vmul.f32 0.5, %v650_v62 }
 0x2e9   : > { %v777_v2 = vmul.f32 0.5, %v776_v63  ;;  %v652_v10 = vsub.f32 1.5, %v651_v0 }
 0x2ea   : > { %v1866_v4 = vpop.eup %1320 }
 0x2eb   : > { %v778_v5 = vsub.f32 1.5, %v777_v2  ;;  %v687_v6 = vmul.f32 %v1866_v4, %v1851_v55  ;;  %v683_v7 = vpop.xlane.xlu0 %682 }
 0x2ec   : > { %v1879_v8 = vpop.eup %1322  ;;  %v1885_v11 = vmax.f32 %v683_v7, 1e-24 }
 0x2ed   : > { %v779_v12 = vmul.f32 %v1319_v58, %v778_v5  ;;  %v659_v13 = vmul.f32 %v1879_v8, %v1855_v59  ;;  %v688_v16 = vmul.f32 %v1866_v4, %v687_v6 }
 0x2ee   : > { %1324 = vrsqrt.f32 %v1885_v11 }
 0x2ef   : > { %1443 = shalt.err (!%p1440_p1)
}
 0x2f0   : > { %s1604_s22 = smov 4   ;;  %vm655_vm8 = vweird.f32 %v1849_v54  ;;  %v660_v17 = vmul.f32 %v1879_v8, %v659_v13  ;;  %v783_v18 = vsel %vm1893_vm7, %v1319_v58, %v779_v12  ;;  %s837_s14 = scalar_lea.hbm %s2041_s5, %s1864_s26  ;;  %v653_v19 = vmul.f32 %v1849_v54, %v652_v10 }
 0x2f1   : > { %1182 = dma.vmem_to_hbm [thread:$0]  (%p1704_p8), %s1868_s23, 128, %s860_s27, %s1899_s30, %s1602_s24, %s1602_s24, %s1604_s22   ;;  %v689_v20 = vmul.f32 0.5, %v688_v16  ;;  %v784_v21 = vmul.f32 %v773_v14, %v1796_v46  ;;  %v785_v22 = vmul.f32 %v783_v18, %v1815_v3  ;;  %vm654_vm9 = vweird.f32 %v1843_v45 }
 0x2f2   : > { %s838_s11 = sshll.u32 %s1804_s21, 4  ;;  %s840_s23 = sshll.u32 %s837_s14, 4  ;;  %v661_v23 = vmul.f32 0.5, %v660_v17  ;;  %vm693_vm10 = vweird.f32 %v1866_v4  ;;  %s839_s11 = int_to_ptr.vmem [resolvable:$true] %s838_s11  ;;  %s841_s23 = int_to_ptr.hbm [resolvable:$true] %s840_s23 }
 0x2f3   : > { %v690_v24 = vsub.f32 1.5, %v689_v20  ;;  %v1281_v25 = vpack.i.bf16 %v785_v22, %v784_v21  ;;  %s809_s27 = scalar_lea.sflag [#allocation4], %s1756_s1  ;;  %s1458_s21 = sshra.s32 %s841_s23, 4  ;;  %s1459_s21 = int_to_ptr.hbm [resolvable:$true] %s1458_s21 }
 0x2f4   : > { %s1460_s10 = scalar_lea.hbm %s1459_s21, 8  ;;  %s1464_s18 = scalar_lea.hbm %s2041_s5, 16 }
 0x2f5   : > { %p1461_p2 = scmp.ne.s32.totalorder %s1459_s21, %s1460_s10  ;;  %p1465_p5 = scmp.lt.s32.totalorder %s1459_s21, %s2041_s5 }
 0x2f6   : > { %p1466_p3 = scmp.lt.s32.totalorder %s1464_s18, %s1460_s10 }
 0x2f7   : > { %p1462_p4 = pnand %p1461_p2, %p1704_p8 }
 0x2f8   : > { %p1467_p7 = por %p1466_p3, %p1465_p5 }
 0x2f9   : > { %p1463_p6 = pneg %p1462_p4 }
 0x2fb   : > { %p1468_p10 = pnand %p1467_p7, %p1463_p6 }
 0x2fd   : > { %1471 = shalt.err (!%p1468_p10)
}
 0x2fe   : > { %1181 = dma.vmem_to_hbm [thread:$0]  (%p1704_p8), %s839_s11, 128, %s841_s23, %s809_s27, %s1602_s24, %s1602_s24, %s1604_s22   ;;  %vm656_vm11 = vmor %vm654_vm9, %vm655_vm8  ;;  %v1325_v26 = vpop.eup %1324  ;;  %v691_v28 = vmul.f32 %v1866_v4, %v690_v24  ;;  %vm692_vm12 = vweird.f32 %v1851_v55  ;;  %v662_v29 = vsub.f32 1.5, %v661_v23  ;;  %vm665_vm14 = vweird.f32 %v1879_v8 }
 0x2ff   : > { %v657_v27 = vsel %vm656_vm11, %v1849_v54, %v653_v19  ;;  %1282 = vrot.lane.b32.xlu0 %v1281_v25, %s1602_s24  ;;  %vm694_vm13 = vmor %vm692_vm12, %vm693_vm10  ;;  %v697_v30 = vmul.f32 %v1325_v26, %v1885_v11  ;;  %vm664_vm15 = vweird.f32 %v1855_v59  ;;  %vm703_vm2 = vweird.f32 %v1325_v26  ;;  %s401_s3 = scalar_lea.vmem [#allocation11], %s1793_s15  ;;  %s875_s11 = scalar_lea.hbm %s2043_s7, %s1864_s26 }
 0x300   : > { %v695_v31 = vsel %vm694_vm13, %v1866_v4, %v691_v28  ;;  %v668_v32 = vmul.f32 %v657_v27, %v1796_v46  ;;  %v663_v35 = vmul.f32 %v1879_v8, %v662_v29  ;;  %vm666_vm3 = vmor %vm664_vm15, %vm665_vm14  ;;  %vm702_vm4 = vweird.f32 %v1885_v11  ;;  %s876_s23 = sshll.u32 %s401_s3, 4  ;;  %s878_s27 = sshll.u32 %s875_s11, 4  ;;  %s877_s23 = int_to_ptr.vmem [resolvable:$true] %s876_s23  ;;  %s879_s27 = int_to_ptr.hbm [resolvable:$true] %s878_s27 }
 0x301   : > { %v706_v33 = vmul.f32 %v695_v31, %v1796_v46  ;;  %v698_v34 = vmul.f32 %v1325_v26, %v697_v30  ;;  %vm704_vm5 = vmor %vm702_vm4, %vm703_vm2  ;;  %s1486_s21 = sshra.s32 %s879_s27, 4  ;;  %s1492_s18 = scalar_lea.hbm %s2043_s7, 16  ;;  %s1487_s21 = int_to_ptr.hbm [resolvable:$true] %s1486_s21 }
 0x302   : > { %v667_v46 = vsel %vm666_vm3, %v1879_v8, %v663_v35  ;;  %s1488_s10 = scalar_lea.hbm %s1487_s21, 8  ;;  %p1493_p1 = scmp.lt.s32.totalorder %s1487_s21, %s2043_s7 }
 0x303   : > { %v708_v36 = vsel %vm417_vm0, %v668_v32, %v706_v33  ;;  %v699_v37 = vmul.f32 0.5, %v698_v34  ;;  %v669_v42 = vmul.f32 %v667_v46, %v1815_v3  ;;  %p1489_p11 = scmp.ne.s32.totalorder %s1487_s21, %s1488_s10  ;;  %p1494_p2 = scmp.lt.s32.totalorder %s1492_s18, %s1488_s10 }
 0x304   : > { %v710_v38 = vpack.c.bf16 %v708_v36, %v708_v36 }
 0x305   : > { %v700_v39 = vsub.f32 1.5, %v699_v37  ;;  %p1490_p12 = pnand %p1489_p11, %p1704_p8  ;;  %p1495_p4 = por %p1494_p2, %p1493_p1 }
 0x306   : > { %712 = vst.msk [vmem:[%s401_s3] sm:$0xf] %vm625_vm1, %v710_v38 }
 0x307   : > { %v701_v40 = vmul.f32 %v1325_v26, %v700_v39  ;;  %p1491_p0 = pneg %p1490_p12 }
 0x309   : > { %v705_v41 = vsel %vm704_vm5, %v1325_v26, %v701_v40  ;;  %p1496_p6 = pnand %p1495_p4, %p1491_p0 }
 0x30a   : > { %v707_v43 = vmul.f32 %v705_v41, %v1815_v3 }
 0x30c   : > { %v709_v44 = vsel %vm417_vm0, %v669_v42, %v707_v43 }
 0x30d   : > { %v711_v45 = vpack.c.bf16 %v709_v44, %v709_v44 }
 0x30f   : > { %713 = vst.msk [vmem:[%s401_s3 + $0x4] sm:$0xf] %vm625_vm1, %v711_v45 }
 0x310   : > { %1499 = shalt.err (!%p1496_p6)
}
 0x311   : > { %1183 = dma.vmem_to_hbm [thread:$0]  (%p1704_p8), %s877_s23, 128, %s879_s27, %s1899_s30, %s1602_s24, %s1602_s24, %s1604_s22  }
 0x312   : > { %s2070_s14 = sld [smem:[#allocation24_spill]]  ;;  %s408_s21 = scalar_lea.vmem [#allocation12], %s1793_s15 }
 0x313   : > { %s895_s10 = sshll.u32 %s408_s21, 4  ;;  %s896_s10 = int_to_ptr.vmem [resolvable:$true] %s895_s10 }
 0x318   : > { %s894_s11 = scalar_lea.hbm %s2070_s14, %s1864_s26  ;;  %s824_s26 = scalar_lea.sflag [#allocation13], %s1756_s1 }
 0x319   : > { %s897_s12 = sshll.u32 %s894_s11, 4  ;;  %s1520_s13 = scalar_lea.hbm %s2070_s14, 16  ;;  %s898_s12 = int_to_ptr.hbm [resolvable:$true] %s897_s12 }
 0x31a   : > { %s1514_s30 = sshra.s32 %s898_s12, 4  ;;  %s1515_s30 = int_to_ptr.hbm [resolvable:$true] %s1514_s30 }
 0x31b   : > { %s1516_s23 = scalar_lea.hbm %s1515_s30, 8  ;;  %p1521_p10 = scmp.lt.s32.totalorder %s1515_s30, %s2070_s14 }
 0x31c   : > { %p1517_p5 = scmp.ne.s32.totalorder %s1515_s30, %s1516_s23  ;;  %p1522_p11 = scmp.lt.s32.totalorder %s1520_s13, %s1516_s23 }
 0x31e   : > { %p1518_p3 = pnand %p1517_p5, %p1704_p8  ;;  %p1523_p12 = por %p1522_p11, %p1521_p10 }
 0x320   : > { %p1519_p7 = pneg %p1518_p3 }
 0x322   : > { %p1524_p0 = pnand %p1523_p12, %p1519_p7 }
 0x34e   : > { %v1278_v3 = vpop.permute.xlu1 %1277 }
 0x34f   : > { %v1280_v48 = vunpack.i.h.bf16 %v1278_v3  ;;  %v1279_v49 = vunpack.i.l.bf16 %v1278_v3 }
 0x371   : > { %v1283_v47 = vpop.permute.xlu0 %1282 }
 0x372   : > { %v1285_v50 = vunpack.i.h.bf16 %v1283_v47  ;;  %v1284_v51 = vunpack.i.l.bf16 %v1283_v47 }
 0x374   : > { %v802_v52 = vsel %vm417_vm0, %v1279_v49, %v1284_v51  ;;  %v803_v53 = vsel %vm417_vm0, %v1280_v48, %v1285_v50 }
 0x375   : > { %v804_v54 = vpack.c.bf16 %v802_v52, %v802_v52  ;;  %v805_v55 = vpack.c.bf16 %v803_v53, %v803_v53 }
 0x377   : > { %806 = vst.msk [vmem:[%s408_s21] sm:$0xf] %vm625_vm1, %v804_v54 }
 0x378   : > { %807 = vst.msk [vmem:[%s408_s21 + $0x4] sm:$0xf] %vm625_vm1, %v805_v55 }
 0x379   : > { %1527 = shalt.err (!%p1524_p0)
}
 0x37a   : > { %1184 = dma.vmem_to_hbm [thread:$0]  (%p1704_p8), %s896_s10, 128, %s898_s12, %s824_s26, %s1602_s24, %s1602_s24, %s1604_s22  }
 0x37b PF: > { %s2071_s1 = sld [smem:[#allocation19_spill]]  ;;  %p1201_p1 = pnand %p1114_p13, %p1708_p9 }
 0x37c   : > { %s2073_s3 = sld [smem:[#allocation20_spill]] }
 0x37d   : > { %p1202_p2 = pneg %p1201_p1 }
 0x381   : > { %s912_s17 = sand.u32 1, %s2071_s1  }
 0x382   : > { %s913_s11 = scalar_lea.sflag [#allocation4], %s912_s17 }
 0x383   : > { %1561 = dma.done.wait (%p1202_p2), %s913_s11, 128  }
 0x384   : > { %1563 = vsyncadd (%p1202_p2), %s913_s11, 4294967168  ;;  %s2074_s21 = sadd.s32 4294967294, %s2073_s3  }
 0x385   : > { %s922_s30 = sand.u32 1, %s2074_s21  }
 0x386   : > { %s923_s16 = scalar_lea.sflag [#allocation10], %s922_s30 }
 0x387   : > { %1565 = dma.done.wait (%p1202_p2), %s923_s16, 256  }
 0x388   : > { %1567 = vsyncadd (%p1202_p2), %s923_s16, 4294967040  ;;  %s943_s23 = scalar_lea.sflag [#allocation13], %s912_s17 }
 0x389   : > { %1569 = dma.done.wait (%p1202_p2), %s943_s23, 128  }
 0x38a   : > { %1571 = vsyncadd (%p1202_p2), %s943_s23, 4294967168  ;;  %s32_s10 = sadd.s32 1, %s2073_s3   ;;  %s2075_s27 = smov %s1578_s28 }
 0x38b   : > { %p29_p8 = scmp.ge.s32.totalorder %s32_s10, 4   ;;  %s2076_s28 = smov %s1582_s29 }
 0x38c   : > { %s2077_s29 = smov %s1751_s8  ;;  %s2078_s30 = smov %s1590_s9 }
 0x38d   : > { %s2079_s9 = smov %s2081_s25  ;;  %31 = sbr.rel (!%p29_p8) target bundleno = 15 (0xf), region = 142 }
 0x392   :  { %949 = vsyncpa [#allocation3], 1 }
 0x393   :  { %951 = vsyncpa [#allocation3 + $0x1], 1 }
 0x394   :  { %952 = vsyncpa [#allocation6], 1 }
 0x395   :  { %953 = vsyncpa [#allocation4], 1 }
 0x396   :  { %955 = vsyncpa [#allocation4 + $0x1], 1 }
 0x397   :  { %956 = vsyncpa [#allocation10], 1 }
 0x398   :  { %958 = vsyncpa [#allocation10 + $0x1], 1 }
 0x399   :  { %959 = vsyncpa [#allocation13], 1 }
 0x39a   :  { %961 = vsyncpa [#allocation13 + $0x1], 1 }

</bundles_post_ra>
